<compile_context>
chip_gen: v7x
topology: tpu7x:2x2x1
jax: 0.10.0
libtpu: 0.0.40
codegen_flags: <defaults>
</compile_context>

<pallas_src>
import functools

import jax
import jax.numpy as jnp
import numpy as np
from jax.experimental import pallas as pl
from jax.experimental.pallas import tpu as pltpu


def tagger_kernel(x_ref, w_ref, b_ref, out_ref):
    # x_ref: (tn, D)   bf16 row-tile of consolidated token features
    # w_ref: (D, Opad) bf16 pre-transposed Linear weight (class dim lane-padded)
    # b_ref: (1, Opad) f32 bias (-1e30 in padded class lanes)
    logits = jnp.dot(x_ref[...], w_ref[...],
                     preferred_element_type=jnp.float32) + b_ref[...]
    m = jnp.max(logits, axis=-1, keepdims=True)
    p = jnp.exp(logits - m)
    denom = jnp.sum(p, axis=-1, keepdims=True)
    inv = pl.reciprocal(denom, approx=True)      # EUP slot
    inv = inv * (2.0 - denom * inv)              # one Newton step -> ~exact f32
    out_ref[...] = p * inv


def _round_up(x, m):
    return -(-x // m) * m


def prepare_tagger_params(w_proj, b_proj):
    """Per-model (hoisted) prep: W^T in bf16, class dim padded to 128 lanes.

    w_proj: (O, D) torch-layout Linear weight.  b_proj: (O,) bias.
    Returns w: (D, Opad) bf16, b: (1, Opad) f32 with -1e30 in padded lanes.
    """
    O, D = w_proj.shape
    Opad = _round_up(max(O, 128), 128)
    w = jnp.asarray(w_proj, jnp.bfloat16).T                       # (D, O)
    w = jnp.pad(w, ((0, 0), (0, Opad - O)))                       # zero columns
    b = jnp.asarray(b_proj, jnp.float32).reshape(1, O)
    b = jnp.pad(b, ((0, 0), (0, Opad - O)), constant_values=-1e30)
    return w, b


def tagger(feats, w, b, *, num_classes, row_block=512):
    """feats: (N, D) consolidated token features (all sentences concatenated).
    w, b: prepared by prepare_tagger_params.  Returns (N, num_classes) probs."""
    N, D = feats.shape
    Opad = w.shape[1]

    # MXU operand; under jit this cast fuses with whatever produced feats.
    x = jnp.asarray(feats, jnp.bfloat16)

    # Row tile: >=2 grid steps when N allows (v7x megacore), multiple of 8
    # sublanes, capped by a VMEM budget that is safe on v5e/v6e/v7x.
    vmem_budget = 40 * 1024 * 1024
    fixed = 2 * D * Opad * 2 + 2 * Opad * 4        # W (worst-case x2 bufs) + bias
    per_row = 2 * D * 2 + 2 * Opad * 4             # feats bf16 (x2) + out f32 (x2)
    tn_vmem = max(8, (vmem_budget - fixed) // per_row)
    tn = min(row_block, _round_up(pl.cdiv(N, 2), 8), tn_vmem)
    tn = max(8, (tn // 8) * 8)

    grid = (pl.cdiv(N, tn),)                       # ragged last tile handled by Pallas
    need = fixed + tn * per_row
    vmem_limit = int(min(max(2 * need, 16 * 1024 * 1024), 48 * 1024 * 1024))

    out = pl.pallas_call(
        tagger_kernel,
        out_shape=jax.ShapeDtypeStruct((N, Opad), jnp.float32),
        grid_spec=pltpu.PrefetchScalarGridSpec(
            num_scalar_prefetch=0,
            grid=grid,
            in_specs=[
                pl.BlockSpec((tn, D), lambda i: (i, 0)),     # feats row-tile
                pl.BlockSpec((D, Opad), lambda i: (0, 0)),   # W^T (VMEM-resident)
                pl.BlockSpec((1, Opad), lambda i: (0, 0)),   # bias
            ],
            out_specs=pl.BlockSpec((tn, Opad), lambda i: (i, 0)),
        ),
        compiler_params=pltpu.CompilerParams(
            dimension_semantics=("parallel",),
            vmem_limit_bytes=vmem_limit),
    )(x, w, b)
    return out[:, :num_classes]


tagger_jit = jax.jit(tagger, static_argnames=("num_classes", "row_block"))


if __name__ == "__main__":
    # Small shapes consistent with the module: 2 sentences x 8 consolidated
    # tokens each (stand-in for encoder + _consolidate_features), encoder hidden
    # D=32, output_dim O=16.  The module concatenates sentences -> N = 2*8 = 16.
    B, S, D, O = 2, 8, 32, 16
    N = B * S

    key = jax.random.PRNGKey(0)
    kf, kw, kb = jax.random.split(key, 3)

    # "Consolidated" per-token features, already concatenated across sentences.
    feats = jax.random.normal(kf, (B, S, D), dtype=jnp.float32).reshape(N, D)

    # torch.nn.Linear default init: U[-1/sqrt(in), 1/sqrt(in)].
    bound = 1.0 / np.sqrt(D)
    w_proj = jax.random.uniform(kw, (O, D), jnp.float32, -bound, bound)
    b_proj = jax.random.uniform(kb, (O,), jnp.float32, -bound, bound)

    w, b = prepare_tagger_params(w_proj, b_proj)     # hoisted: once per model
    out = tagger_jit(feats, w, b, num_classes=O)
    out = jax.block_until_ready(out)

    # Reference with matching bf16 matmul precision, f32 softmax.
    logits = jnp.dot(feats.astype(jnp.bfloat16), w_proj.astype(jnp.bfloat16).T,
                     preferred_element_type=jnp.float32) + b_proj
    ref = jax.nn.softmax(logits, axis=-1)

    np.testing.assert_allclose(np.asarray(out), np.asarray(ref),
                               rtol=2e-3, atol=2e-3)
    # Rows must sum to 1 (Newton-refined reciprocal -> ~f32 exact).
    np.testing.assert_allclose(np.asarray(out).sum(-1), np.ones(N),
                               rtol=1e-3, atol=1e-3)

    print("KERNEL_OK")
</pallas_src>

<mosaic_0001>
module attributes {stable_mosaic.version = 11 : i64} {
  func.func @tagger_kernel(%arg0: i32, %arg1: memref<8x32xbf16, #tpu.memory_space<vmem>>, %arg2: memref<32x128xbf16, #tpu.memory_space<vmem>>, %arg3: memref<1x128xf32, #tpu.memory_space<vmem>>, %arg4: memref<8x128xf32, #tpu.memory_space<vmem>>) attributes {dimension_semantics = [#tpu.dimension_semantics<parallel>], iteration_bounds = array<i64: 2>, scalar_prefetch = 0 : i64, scratch_operands = 0 : i64, tpu.core_type = #tpu.core_type<tc>, window_params = [{transform_indices = @transform_0, window_bounds = array<i64: 8, 32>}, {pipeline_mode = #tpu.pipeline_mode<synchronous>, transform_indices = @transform_1, window_bounds = array<i64: 32, 128>}, {pipeline_mode = #tpu.pipeline_mode<synchronous>, transform_indices = @transform_2, window_bounds = array<i64: 1, 128>}, {transform_indices = @transform_3, window_bounds = array<i64: 8, 128>}]} {
    %c0 = arith.constant 0 : index
    %c0_0 = arith.constant 0 : index
    %0 = vector.load %arg1[%c0, %c0_0] : memref<8x32xbf16, #tpu.memory_space<vmem>>, vector<8x32xbf16>
    %c0_1 = arith.constant 0 : index
    %c0_2 = arith.constant 0 : index
    %1 = vector.load %arg2[%c0_1, %c0_2] : memref<32x128xbf16, #tpu.memory_space<vmem>>, vector<32x128xbf16>
    %cst = arith.constant dense<0.000000e+00> : vector<8x128xf32>
    %2 = tpu.matmul %0, %1, %cst {dimension_numbers = #tpu.dot_dimension_numbers<[1], [0], [0], [1], [0, 0, 1, 1], [], []>} : vector<8x32xbf16>, vector<32x128xbf16>, vector<8x128xf32> -> vector<8x128xf32>
    %c0_3 = arith.constant 0 : index
    %c0_4 = arith.constant 0 : index
    %3 = vector.load %arg3[%c0_3, %c0_4] : memref<1x128xf32, #tpu.memory_space<vmem>>, vector<1x128xf32>
    %4 = vector.broadcast %3 : vector<1x128xf32> to vector<8x128xf32>
    %5 = arith.addf %2, %4 : vector<8x128xf32>
    %cst_5 = arith.constant dense<0xFF800000> : vector<8xf32>
    %6 = vector.multi_reduction <maximumf>, %5, %cst_5 [1] : vector<8x128xf32> to vector<8xf32>
    %7 = vector.shape_cast %6 : vector<8xf32> to vector<8x1xf32>
    %8 = vector.broadcast %7 : vector<8x1xf32> to vector<8x128xf32>
    %9 = arith.subf %5, %8 : vector<8x128xf32>
    %10 = math.exp %9 : vector<8x128xf32>
    %cst_6 = arith.constant dense<0.000000e+00> : vector<8xf32>
    %11 = vector.multi_reduction <add>, %10, %cst_6 [1] : vector<8x128xf32> to vector<8xf32>
    %12 = vector.shape_cast %11 : vector<8xf32> to vector<8x1xf32>
    %13 = tpu.reciprocal %12 {approx = true} : vector<8x1xf32> -> vector<8x1xf32>
    %14 = arith.mulf %12, %13 : vector<8x1xf32>
    %cst_7 = arith.constant 2.000000e+00 : f32
    %15 = vector.broadcast %cst_7 : f32 to vector<8x1xf32>
    %16 = arith.subf %15, %14 : vector<8x1xf32>
    %17 = arith.mulf %13, %16 : vector<8x1xf32>
    %18 = vector.broadcast %17 : vector<8x1xf32> to vector<8x128xf32>
    %19 = arith.mulf %10, %18 : vector<8x128xf32>
    %c0_8 = arith.constant 0 : index
    %c0_9 = arith.constant 0 : index
    %20 = vector.load %arg4[%c0_8, %c0_9] : memref<8x128xf32, #tpu.memory_space<vmem>>, vector<8x128xf32>
    tpu.vector_store %arg4[%c0_8, %c0_9], %19 {strides = array<i32>} : memref<8x128xf32, #tpu.memory_space<vmem>>, vector<8x128xf32>,
    return
  }
  func.func @transform_0(%arg0: i32) -> (i32, i32) {
    %c0_i32 = arith.constant 0 : i32
    %c0_i32_0 = arith.constant 0 : i32
    return %arg0, %c0_i32 : i32, i32
  }
  func.func @transform_1(%arg0: i32) -> (i32, i32) {
    %c0_i32 = arith.constant 0 : i32
    %c0_i32_0 = arith.constant 0 : i32
    %c0_i32_1 = arith.constant 0 : i32
    return %c0_i32, %c0_i32_0 : i32, i32
  }
  func.func @transform_2(%arg0: i32) -> (i32, i32) {
    %c0_i32 = arith.constant 0 : i32
    %c0_i32_0 = arith.constant 0 : i32
    %c0_i32_1 = arith.constant 0 : i32
    return %c0_i32, %c0_i32_0 : i32, i32
  }
  func.func @transform_3(%arg0: i32) -> (i32, i32) {
    %c0_i32 = arith.constant 0 : i32
    %c0_i32_0 = arith.constant 0 : i32
    return %arg0, %c0_i32 : i32, i32
  }
}

</mosaic_0001>

<bundles_post_ra>
// kernel: tagger.1
= control target key start
LH: loop header
LB: loop body
LE: loop exit
PB: predicated region body
PF: predicated region fallthrough
CT: control target
= control target key end

     0   :  { %8 = vsyncpa [#allocation3], 0  ;;  %s589_s0 = inlined_call_operand.vmem [shape: bf16[16,32], index: 0, kind: input, shape index: {}]   ;;  %s590_s1 = inlined_call_operand.vmem [shape: bf16[32,128], index: 1, kind: input, shape index: {}]   ;;  %s591_s2 = inlined_call_operand.vmem [shape: f32[1,128], index: 2, kind: input, shape index: {}]   ;;  %s592_s3 = inlined_call_operand.hbm [shape: f32[16,128], index: 3, kind: output, shape index: {}]  }
   0x1   :  { %10 = vsyncpa [#allocation3 + $0x1], 0  ;;  %s480_s12 = smov 0   ;;  %s482_s13 = smov 0  }
   0x2   :  { %s484_s14 = smov 0   ;;  %s486_s15 = smov 0  }
   0x3 LB: > { %s501_s16 = sadd.s32 4294967295, %s455_s15   ;;  %s321_s17 = sadd.s32 4294967294, %s455_s15   ;;  %s455_s15 = sphi %s486_s15, %s598_s15   ;;  %s451_s14 = sphi %s484_s14, %s597_s14   ;;  %s447_s13 = sphi %s482_s13, %s596_s13   ;;  %s443_s12 = sphi %s480_s12, %s595_s12  }
   0x4   : > { %s505_s18 = sadd.s32 1, %s455_s15   ;;  %s91_s19 = sadd.s32 1, %s451_s14 }
   0x5   : > { %s88_s20 = ssub.s32 %s455_s15, %s505_s18  ;;  %p101_p0 = scmp.ne.s32.totalorder %s451_s14, %s447_s13 }
   0x6   : > { %p89_p1 = scmp.eq.s32.totalorder %s88_s20, 0  ;;  %p102_p2 = scmp.eq.s32.totalorder %s501_s16, 1 }
   0x7   : > { %p107_p3 = scmp.ne.s32.totalorder %s447_s13, %s443_s12  ;;  %p108_p4 = scmp.eq.s32.totalorder %s321_s17, 1 }
   0x8   : > { %s516_s21 = scalar_select %p89_p1, %s451_s14, %s91_s19  }
   0x9   : > { %p518_p5 = por %p102_p2, %p101_p0  ;;  %p522_p6 = por %p108_p4, %p107_p3 }
   0xa   : > { %p324_p7 = scmp.ge.s32.totalorder %s455_s15, 1  ;;  %p139_p8 = scmp.lt.s32.totalorder %s455_s15, 3 }
   0xc   : > { %p140_p9 = pnand %p324_p7, %p139_p8 }
   0xd   : > { %v387_v0 = vld [vmem:[%s590_s1] sm:$0xff] (!%p140_p9)   ;;  %v457_v1 = vmov (!%p140_p9), 0.0   ;;  %v388_v2 = vld [vmem:[%s590_s1 + $0x8] sm:$0xff] (!%p140_p9)   ;;  %vm458_vm0 = vmmov (!%p140_p9), 0   ;;  %p162_p10 = scmp.lt.s32.totalorder (!%p140_p9), %s501_s16, 1  ;;  %vm191_vm1 = vcmask (!%p140_p9), 261120  }
   0xe   : > { %143 = sbr.rel (%p140_p9) target bundleno = 572 (0x23c), region = 32  ;;  %338 = vmatprep.subr.bf16.mxu0 (!%p140_p9), %v457_v1  ;;  %342 = vmatprep.mubr.msk.bf16.mxu0 (!%p140_p9), %vm458_vm0, %v457_v1  ;;  %v327_v4 = vld [vmem:[%s591_s2] ss:$0 sm:$0xff] (!%p140_p9)  ;;  %s159_s8 = sand.u32 (!%p140_p9), 1, %s447_s13  }
   0xf   : > { %339 = vmatpush3.bf16.msra.mxu0 (!%p140_p9), %v387_v0  ;;  %s325_s9 = sshll.u32 (!%p140_p9), %s159_s8, 3  ;;  %s332_s10 = sshll.u32 (!%p140_p9), %s501_s16, 7 }
  0x10   : > { %340 = vmatprep.subr.bf16.mxu0 (!%p140_p9), %v457_v1  ;;  %s161_s11 = scalar_lea.vmem (!%p140_p9), [#allocation2], %s325_s9  ;;  %s547_s24 = scalar_lea.hbm (!%p140_p9), %s592_s3, %s332_s10 }
  0x11   : > { %s262_s17 = sshll.u32 (!%p140_p9), %s161_s11, 4  ;;  %s249_s25 = scalar_lea.sflag (!%p140_p9), [#allocation3], %s159_s8  ;;  %s549_s17 = int_to_ptr.vmem [resolvable:$true] %s262_s17 }
  0x12   : > { %s393_s26 = scalar_lea.vmem (!%p140_p9), %s549_s17, 128 }
  0x13   : > { %341 = vmatpush3.bf16.msra.mxu0 (!%p140_p9), %v388_v2  ;;  %p394_p11 = scmp.ne.s32.totalorder (!%p140_p9), %s549_s17, %s393_s26 }
  0x15   : > { %s163_s28 = scalar_select %p162_p10, %s501_s16, 1 }
  0x16   : > { %p395_p12 = pnand %p394_p11, %p518_p5  ;;  %s459_s16 = smov [#allocation2]  }
  0x17   : > { %s326_s29 = sshll.u32 %s163_s28, 2  ;;  %s397_s27 = sshll.u32 %s459_s16, 4  ;;  %s398_s27 = int_to_ptr.vmem [resolvable:$false] %s397_s27 }
  0x18   : > { %s165_s5 = scalar_lea.vmem %s589_s0, %s326_s29  ;;  %p396_p13 = pneg %p395_p12 }
  0x19   : > { %v167_v3 = vld [vmem:[%s165_s5] sm:$0xf]  ;;  %s399_s28 = scalar_lea.vmem %s398_s27, 256  ;;  %p400_p0 = scmp.lt.s32.totalorder %s549_s17, %s398_s27 }
  0x1a   : > { %343 = vmatmul.mubr.msk.bf16.vlgmr.msra.gmra.mrb[0].mxu0 %vm191_vm1, %v167_v3  ;;  %p401_p1 = scmp.lt.s32.totalorder %s399_s28, %s393_s26 }
  0x1c   : > { %p402_p2 = por %p401_p1, %p400_p0 }
  0x1e   : > { %p403_p3 = pnand %p402_p2, %p396_p13 }
  0xed   : > { %v229_v5 = vpop.f32.mrb[0].mxu0 }
  0xee   : > { %v230_v6 = vadd.f32 %v327_v4, %v229_v5  ;;  %v344_v7 = vpop.f32.mrb[1].mxu0 }
  0xef   : > { %v232_v8 = vpop.f32.mrb[2].mxu0 }
  0xf0   : > { %235 = vmax.xlane.f32.xlu0 %v230_v6  ;;  %v345_v9 = vpop.f32.mrb[3].mxu0 }
 0x17d   : > { %v236_v10 = vpop.xlane.xlu0 %235 }
 0x17e   : > { %v237_v11 = vsub.f32 %v230_v6, %v236_v10 }
 0x180   : > { %v238_v12 = vmul.f32 1.442695, %v237_v11 }
 0x182   : > { %389 = vpow2.f32 %v238_v12 }
 0x18c   : > { %v390_v13 = vpop.eup %389 }
 0x18d   : > { %240 = vadd.xlane.f32.xlu0 %v390_v13 }
 0x21a   : > { %v241_v14 = vpop.xlane.xlu0 %240 }
 0x21b   : > { %391 = vrcp.f32 %v241_v14 }
 0x225   : > { %v392_v15 = vpop.eup %391 }
 0x226   : > { %v243_v16 = vmul.f32 %v392_v15, %v241_v14 }
 0x228   : > { %v244_v17 = vsub.f32 2.0, %v243_v16 }
 0x22a   : > { %v245_v18 = vmul.f32 %v392_v15, %v244_v17 }
 0x22c   : > { %v246_v19 = vmul.f32 %v390_v13, %v245_v18 }
 0x22e   : > { %247 = vst [vmem:[%s161_s11] sm:$0xff] %v246_v19 }
 0x22f   : > { %406 = shalt.err (!%p403_p3)
}
 0x230   : > { %s407_s29 = scalar_lea.hbm %s547_s24, 128  ;;  %s411_s5 = scalar_lea.hbm %s592_s3, 256 }
 0x231   : > { %p408_p4 = scmp.ne.s32.totalorder %s547_s24, %s407_s29  ;;  %p412_p9 = scmp.lt.u32.totalorder %s547_s24, %s592_s3 }
 0x232   : > { %p413_p10 = scmp.lt.u32.totalorder %s411_s5, %s407_s29  ;;  %p415_p12 = scmp.lt.u32.totalorder %s407_s29, %s547_s24 }
 0x233   : > { %p409_p7 = pnand %p408_p4, %p518_p5 }
 0x234   : > { %p414_p11 = por %p413_p10, %p412_p9 }
 0x235   : > { %p410_p8 = pneg %p409_p7 }
 0x236   : > { %p416_p13 = por %p415_p12, %p414_p11 }
 0x238   : > { %p417_p0 = pnand %p416_p13, %p410_p8 }
 0x23a   : > { %420 = shalt.err (!%p417_p0)
}
 0x23b   : > { %346 = dma.vmem_to_hbm [thread:$0]  (%p518_p5), %s549_s17, 128, %s547_s24, %s249_s25  }
 0x23c PF: > { %p352_p1 = scmp.ge.s32.totalorder %s455_s15, 2  ;;  %s274_s8 = sand.u32 1, %s443_s12  }
 0x23d   : > { %s275_s9 = scalar_lea.sflag [#allocation3], %s274_s8 }
 0x23e   : > { %p349_p2 = pnand %p352_p1, %p522_p6 }
 0x240   : > { %438 = dma.done.wait (!%p349_p2), %s275_s9, 128  }
 0x241   : > { %440 = vsyncadd (!%p349_p2), %s275_s9, 4294967168  ;;  %p13_p3 = scmp.ge.s32.totalorder %s505_s18, 4   ;;  %s595_s12 = smov %s447_s13 }
 0x242   : > { %s596_s13 = smov %s451_s14  ;;  %s597_s14 = smov %s516_s21 }
 0x243   : > { %s598_s15 = smov %s505_s18  ;;  %15 = sbr.rel (!%p13_p3) target bundleno = 3 (0x3), region = 67 }
 0x24a   :  { %280 = vsyncpa [#allocation3], 1 }
 0x24b   :  { %282 = vsyncpa [#allocation3 + $0x1], 1 }

</bundles_post_ra>
